<compile_context>
chip_gen: v6e
topology: v6e:2x2x1
jax: 0.10.0
libtpu: 0.0.40
codegen_flags: <defaults>
</compile_context>

<pallas_src>
import jax
import jax.numpy as jnp
from jax.experimental import pallas as pl
from jax.experimental.pallas import tpu as pltpu

EPS = 1e-5


# -----------------------------------------------------------------------------
# Fused kernel: single invocation, both views, stem + GAP + projection head.
# -----------------------------------------------------------------------------
def _fused_simclr_kernel(xi_ref, xj_ref, wst_ref, w1_ref, g1_ref, b1_ref,
                         w2_ref, g2_ref, b2_ref,
                         f1_ref, f2_ref, p1_ref, p2_ref):
    """Everything VMEM-resident (toy sizes).

      xi_ref/xj_ref : (N, C, S)   S = H*W on the lane axis (no host transpose)
      wst_ref       : (D, C)      1x1-conv stem weight, PyTorch (out, in)
      w1_ref        : (D, D)      fc1 weight (out, in)
      g1/b1_ref     : (1, D)      BN1 gamma / beta rows (lane-dense)
      w2_ref        : (P, D)      fc2 weight (out, in)
      g2/b2_ref     : (1, P)      BN2 gamma / frozen-zero beta
      f1/f2_ref     : (N, D)      pooled features per view (fc == Identity)
      p1/p2_ref     : (N, P)      projections per view
    """
    d = wst_ref.shape[0]
    c_in = wst_ref.shape[1]
    wst = wst_ref[...]                                   # (D, C), load once

    def stem(x):                                         # (N, C, S) -> (N, D)
        # 1x1 conv as C broadcast-FMA passes on the VPU, vectorized over the
        # whole batch at once; single ReLU; single GAP reduction over S.
        h = wst[:, 0:1].reshape(1, d, 1) * x[:, 0:1, :]  # (N, D, S)
        for c in range(1, c_in):                         # C is small & static
            h = h + wst[:, c:c + 1].reshape(1, d, 1) * x[:, c:c + 1, :]
        h = jnp.maximum(h, 0.0)
        return jnp.mean(h, axis=2)                       # (N, D), lane-dense

    def head(feats):                                     # (N, D) -> (N, P)
        # Training-mode BN (biased variance, per-view batch statistics).
        # dot_general contracts the PyTorch (out, in) weights directly — no
        # weight transposes on host or in kernel.
        h1 = jax.lax.dot_general(
            feats, w1_ref[...],
            dimension_numbers=(((1,), (1,)), ((), ())),
            preferred_element_type=jnp.float32)          # (N, D)
        m1 = jnp.mean(h1, axis=0, keepdims=True)
        v1 = jnp.mean(jnp.square(h1 - m1), axis=0, keepdims=True)
        h1 = (h1 - m1) * jax.lax.rsqrt(v1 + EPS)
        h1 = jnp.maximum(h1 * g1_ref[...] + b1_ref[...], 0.0)

        h2 = jax.lax.dot_general(
            h1, w2_ref[...],
            dimension_numbers=(((1,), (1,)), ((), ())),
            preferred_element_type=jnp.float32)          # (N, P)
        m2 = jnp.mean(h2, axis=0, keepdims=True)
        v2 = jnp.mean(jnp.square(h2 - m2), axis=0, keepdims=True)
        h2 = (h2 - m2) * jax.lax.rsqrt(v2 + EPS)
        return h2 * g2_ref[...] + b2_ref[...]            # BN2 beta frozen at 0

    feats_i = stem(xi_ref[...])                          # kept in registers
    feats_j = stem(xj_ref[...])
    f1_ref[...] = feats_i                                # fc == Identity
    f2_ref[...] = feats_j
    p1_ref[...] = head(feats_i)                          # per-view BN stats
    p2_ref[...] = head(feats_j)


# -----------------------------------------------------------------------------
# Wrapper: one launch, lane-dense outputs, no wrapper-side transposes/stack.
# -----------------------------------------------------------------------------
@jax.jit
def simclr_forward(xis, xjs, params):
    n, c, h, w = xis.shape
    s = h * w
    d = params["stem_w"].shape[0]
    p = params["w2"].shape[0]

    xi = xis.reshape(n, c, s)           # contiguous reshape only (no transpose)
    xj = xjs.reshape(n, c, s)           # no jnp.stack: no extra HBM round-trip
    g1 = params["g1"].reshape(1, d)
    b1 = params["b1"].reshape(1, d)
    g2 = params["g2"].reshape(1, p)
    b2 = params["b2"].reshape(1, p)

    vmem = pl.BlockSpec(memory_space=pltpu.MemorySpace.VMEM)
    feats1, feats2, proj1, proj2 = pl.pallas_call(
        _fused_simclr_kernel,
        out_shape=(
            jax.ShapeDtypeStruct((n, d), jnp.float32),
            jax.ShapeDtypeStruct((n, d), jnp.float32),
            jax.ShapeDtypeStruct((n, p), jnp.float32),
            jax.ShapeDtypeStruct((n, p), jnp.float32),
        ),
        in_specs=[vmem] * 9,
        out_specs=(vmem, vmem, vmem, vmem),
    )(xi, xj, params["stem_w"], params["w1"], g1, b1,
      params["w2"], g2, b2)
    return feats1, feats2, proj1, proj2


# -----------------------------------------------------------------------------
# Parameters (PyTorch-native (out, in) weight layouts; BN params as 1D vectors).
# -----------------------------------------------------------------------------
def init_params(key, c_in, d_feat, d_proj):
    k1, k2, k3 = jax.random.split(key, 3)
    return {
        "stem_w": jax.random.normal(k1, (d_feat, c_in), jnp.float32) * 0.1,
        "w1": jax.random.normal(k2, (d_feat, d_feat), jnp.float32) * 0.1,
        "g1": jnp.ones((d_feat,), jnp.float32),
        "b1": jnp.zeros((d_feat,), jnp.float32),
        "w2": jax.random.normal(k3, (d_proj, d_feat), jnp.float32) * 0.1,
        "g2": jnp.ones((d_proj,), jnp.float32),
        "b2": jnp.zeros((d_proj,), jnp.float32),         # BatchNorm1dNoBias: 0
    }


# -----------------------------------------------------------------------------
# Pure-JAX reference (same semantics) for validation.
# -----------------------------------------------------------------------------
def _reference_forward(xis, xjs, params):
    def one_view(xv):
        n, c, h, w = xv.shape
        xf = xv.reshape(n, c, h * w)
        hid = jnp.einsum("dc,ncs->nds", params["stem_w"], xf, precision="highest")
        hid = jnp.maximum(hid, 0.0)
        feats = jnp.mean(hid, axis=-1)                                  # (N, D)

        h1 = jnp.dot(feats, params["w1"].T, precision="highest")
        m1 = h1.mean(axis=0)
        v1 = jnp.square(h1 - m1).mean(axis=0)
        h1 = (h1 - m1) / jnp.sqrt(v1 + EPS)
        h1 = jnp.maximum(h1 * params["g1"] + params["b1"], 0.0)

        h2 = jnp.dot(h1, params["w2"].T, precision="highest")
        m2 = h2.mean(axis=0)
        v2 = jnp.square(h2 - m2).mean(axis=0)
        h2 = (h2 - m2) / jnp.sqrt(v2 + EPS)
        return feats, h2 * params["g2"] + params["b2"]

    f1, p1 = one_view(xis)
    f2, p2 = one_view(xjs)
    return f1, f2, p1, p2


if __name__ == "__main__":
    key = jax.random.PRNGKey(0)
    kp, ki, kj = jax.random.split(key, 3)

    N, C, H, W = 2, 4, 16, 16        # NCHW, like PyTorch
    D_FEAT = 32                      # pjh_inputdim (backbone fc.in_features)
    D_PROJ = 16                      # project_dim

    params = init_params(kp, C, D_FEAT, D_PROJ)
    xis = jax.random.normal(ki, (N, C, H, W), jnp.float32)
    xjs = jax.random.normal(kj, (N, C, H, W), jnp.float32)

    outs = simclr_forward(xis, xjs, params)
    jax.block_until_ready(outs)
    feats1, feats2, proj1, proj2 = outs

    assert feats1.shape == (N, D_FEAT) and feats2.shape == (N, D_FEAT)
    assert proj1.shape == (N, D_PROJ) and proj2.shape == (N, D_PROJ)

    refs = _reference_forward(xis, xjs, params)
    for got, want in zip(outs, refs):
        assert got.shape == want.shape
        assert jnp.allclose(got, want, atol=5e-3, rtol=5e-3), float(
            jnp.max(jnp.abs(got - want)))

    print("KERNEL_OK")
</pallas_src>

<mosaic_0001>
module attributes {stable_mosaic.version = 11 : i64} {
  func.func @_fused_simclr_kernel(%arg0: memref<2x4x256xf32, #tpu.memory_space<vmem>>, %arg1: memref<2x4x256xf32, #tpu.memory_space<vmem>>, %arg2: memref<32x4xf32, #tpu.memory_space<vmem>>, %arg3: memref<32x32xf32, #tpu.memory_space<vmem>>, %arg4: memref<1x32xf32, #tpu.memory_space<vmem>>, %arg5: memref<1x32xf32, #tpu.memory_space<vmem>>, %arg6: memref<16x32xf32, #tpu.memory_space<vmem>>, %arg7: memref<1x16xf32, #tpu.memory_space<vmem>>, %arg8: memref<1x16xf32, #tpu.memory_space<vmem>>, %arg9: memref<2x32xf32, #tpu.memory_space<vmem>>, %arg10: memref<2x32xf32, #tpu.memory_space<vmem>>, %arg11: memref<2x16xf32, #tpu.memory_space<vmem>>, %arg12: memref<2x16xf32, #tpu.memory_space<vmem>>) attributes {dimension_semantics = [], scalar_prefetch = 0 : i64, scratch_operands = 0 : i64, tpu.core_type = #tpu.core_type<tc>} {
    %c0 = arith.constant 0 : index
    %c0_0 = arith.constant 0 : index
    %0 = vector.load %arg2[%c0, %c0_0] : memref<32x4xf32, #tpu.memory_space<vmem>>, vector<32x4xf32>
    %c0_1 = arith.constant 0 : index
    %c0_2 = arith.constant 0 : index
    %c0_3 = arith.constant 0 : index
    %1 = vector.load %arg0[%c0_1, %c0_2, %c0_3] : memref<2x4x256xf32, #tpu.memory_space<vmem>>, vector<2x4x256xf32>
    %2 = vector.extract_strided_slice %0 {offsets = [0, 0], sizes = [32, 1], strides = [1, 1]} : vector<32x4xf32> to vector<32x1xf32>
    %3 = vector.shape_cast %2 : vector<32x1xf32> to vector<1x32x1xf32>
    %4 = vector.extract_strided_slice %1 {offsets = [0, 0, 0], sizes = [2, 1, 256], strides = [1, 1, 1]} : vector<2x4x256xf32> to vector<2x1x256xf32>
    %5 = vector.broadcast %3 : vector<1x32x1xf32> to vector<2x32x256xf32>
    %6 = vector.broadcast %4 : vector<2x1x256xf32> to vector<2x32x256xf32>
    %7 = arith.mulf %5, %6 : vector<2x32x256xf32>
    %8 = vector.extract_strided_slice %0 {offsets = [0, 1], sizes = [32, 1], strides = [1, 1]} : vector<32x4xf32> to vector<32x1xf32>
    %9 = vector.shape_cast %8 : vector<32x1xf32> to vector<1x32x1xf32>
    %10 = vector.extract_strided_slice %1 {offsets = [0, 1, 0], sizes = [2, 1, 256], strides = [1, 1, 1]} : vector<2x4x256xf32> to vector<2x1x256xf32>
    %11 = vector.broadcast %9 : vector<1x32x1xf32> to vector<2x32x256xf32>
    %12 = vector.broadcast %10 : vector<2x1x256xf32> to vector<2x32x256xf32>
    %13 = arith.mulf %11, %12 : vector<2x32x256xf32>
    %14 = arith.addf %7, %13 : vector<2x32x256xf32>
    %15 = vector.extract_strided_slice %0 {offsets = [0, 2], sizes = [32, 1], strides = [1, 1]} : vector<32x4xf32> to vector<32x1xf32>
    %16 = vector.shape_cast %15 : vector<32x1xf32> to vector<1x32x1xf32>
    %17 = vector.extract_strided_slice %1 {offsets = [0, 2, 0], sizes = [2, 1, 256], strides = [1, 1, 1]} : vector<2x4x256xf32> to vector<2x1x256xf32>
    %18 = vector.broadcast %16 : vector<1x32x1xf32> to vector<2x32x256xf32>
    %19 = vector.broadcast %17 : vector<2x1x256xf32> to vector<2x32x256xf32>
    %20 = arith.mulf %18, %19 : vector<2x32x256xf32>
    %21 = arith.addf %14, %20 : vector<2x32x256xf32>
    %22 = vector.extract_strided_slice %0 {offsets = [0, 3], sizes = [32, 1], strides = [1, 1]} : vector<32x4xf32> to vector<32x1xf32>
    %23 = vector.shape_cast %22 : vector<32x1xf32> to vector<1x32x1xf32>
    %24 = vector.extract_strided_slice %1 {offsets = [0, 3, 0], sizes = [2, 1, 256], strides = [1, 1, 1]} : vector<2x4x256xf32> to vector<2x1x256xf32>
    %25 = vector.broadcast %23 : vector<1x32x1xf32> to vector<2x32x256xf32>
    %26 = vector.broadcast %24 : vector<2x1x256xf32> to vector<2x32x256xf32>
    %27 = arith.mulf %25, %26 : vector<2x32x256xf32>
    %28 = arith.addf %21, %27 : vector<2x32x256xf32>
    %cst = arith.constant 0.000000e+00 : f32
    %29 = vector.broadcast %cst : f32 to vector<2x32x256xf32>
    %30 = arith.maximumf %28, %29 : vector<2x32x256xf32>
    %cst_4 = arith.constant dense<0.000000e+00> : vector<2x32xf32>
    %31 = vector.multi_reduction <add>, %30, %cst_4 [2] : vector<2x32x256xf32> to vector<2x32xf32>
    %cst_5 = arith.constant 2.560000e+02 : f32
    %32 = vector.broadcast %cst_5 : f32 to vector<2x32xf32>
    %33 = arith.divf %31, %32 : vector<2x32xf32>
    %c0_6 = arith.constant 0 : index
    %c0_7 = arith.constant 0 : index
    %c0_8 = arith.constant 0 : index
    %34 = vector.load %arg1[%c0_6, %c0_7, %c0_8] : memref<2x4x256xf32, #tpu.memory_space<vmem>>, vector<2x4x256xf32>
    %35 = vector.extract_strided_slice %0 {offsets = [0, 0], sizes = [32, 1], strides = [1, 1]} : vector<32x4xf32> to vector<32x1xf32>
    %36 = vector.shape_cast %35 : vector<32x1xf32> to vector<1x32x1xf32>
    %37 = vector.extract_strided_slice %34 {offsets = [0, 0, 0], sizes = [2, 1, 256], strides = [1, 1, 1]} : vector<2x4x256xf32> to vector<2x1x256xf32>
    %38 = vector.broadcast %36 : vector<1x32x1xf32> to vector<2x32x256xf32>
    %39 = vector.broadcast %37 : vector<2x1x256xf32> to vector<2x32x256xf32>
    %40 = arith.mulf %38, %39 : vector<2x32x256xf32>
    %41 = vector.extract_strided_slice %0 {offsets = [0, 1], sizes = [32, 1], strides = [1, 1]} : vector<32x4xf32> to vector<32x1xf32>
    %42 = vector.shape_cast %41 : vector<32x1xf32> to vector<1x32x1xf32>
    %43 = vector.extract_strided_slice %34 {offsets = [0, 1, 0], sizes = [2, 1, 256], strides = [1, 1, 1]} : vector<2x4x256xf32> to vector<2x1x256xf32>
    %44 = vector.broadcast %42 : vector<1x32x1xf32> to vector<2x32x256xf32>
    %45 = vector.broadcast %43 : vector<2x1x256xf32> to vector<2x32x256xf32>
    %46 = arith.mulf %44, %45 : vector<2x32x256xf32>
    %47 = arith.addf %40, %46 : vector<2x32x256xf32>
    %48 = vector.extract_strided_slice %0 {offsets = [0, 2], sizes = [32, 1], strides = [1, 1]} : vector<32x4xf32> to vector<32x1xf32>
    %49 = vector.shape_cast %48 : vector<32x1xf32> to vector<1x32x1xf32>
    %50 = vector.extract_strided_slice %34 {offsets = [0, 2, 0], sizes = [2, 1, 256], strides = [1, 1, 1]} : vector<2x4x256xf32> to vector<2x1x256xf32>
    %51 = vector.broadcast %49 : vector<1x32x1xf32> to vector<2x32x256xf32>
    %52 = vector.broadcast %50 : vector<2x1x256xf32> to vector<2x32x256xf32>
    %53 = arith.mulf %51, %52 : vector<2x32x256xf32>
    %54 = arith.addf %47, %53 : vector<2x32x256xf32>
    %55 = vector.extract_strided_slice %0 {offsets = [0, 3], sizes = [32, 1], strides = [1, 1]} : vector<32x4xf32> to vector<32x1xf32>
    %56 = vector.shape_cast %55 : vector<32x1xf32> to vector<1x32x1xf32>
    %57 = vector.extract_strided_slice %34 {offsets = [0, 3, 0], sizes = [2, 1, 256], strides = [1, 1, 1]} : vector<2x4x256xf32> to vector<2x1x256xf32>
    %58 = vector.broadcast %56 : vector<1x32x1xf32> to vector<2x32x256xf32>
    %59 = vector.broadcast %57 : vector<2x1x256xf32> to vector<2x32x256xf32>
    %60 = arith.mulf %58, %59 : vector<2x32x256xf32>
    %61 = arith.addf %54, %60 : vector<2x32x256xf32>
    %cst_9 = arith.constant 0.000000e+00 : f32
    %62 = vector.broadcast %cst_9 : f32 to vector<2x32x256xf32>
    %63 = arith.maximumf %61, %62 : vector<2x32x256xf32>
    %cst_10 = arith.constant dense<0.000000e+00> : vector<2x32xf32>
    %64 = vector.multi_reduction <add>, %63, %cst_10 [2] : vector<2x32x256xf32> to vector<2x32xf32>
    %cst_11 = arith.constant 2.560000e+02 : f32
    %65 = vector.broadcast %cst_11 : f32 to vector<2x32xf32>
    %66 = arith.divf %64, %65 : vector<2x32xf32>
    %c0_12 = arith.constant 0 : index
    %c0_13 = arith.constant 0 : index
    %67 = vector.load %arg9[%c0_12, %c0_13] : memref<2x32xf32, #tpu.memory_space<vmem>>, vector<2x32xf32>
    tpu.vector_store %arg9[%c0_12, %c0_13], %33 {strides = array<i32>} : memref<2x32xf32, #tpu.memory_space<vmem>>, vector<2x32xf32>,
    %c0_14 = arith.constant 0 : index
    %c0_15 = arith.constant 0 : index
    %68 = vector.load %arg10[%c0_14, %c0_15] : memref<2x32xf32, #tpu.memory_space<vmem>>, vector<2x32xf32>
    tpu.vector_store %arg10[%c0_14, %c0_15], %66 {strides = array<i32>} : memref<2x32xf32, #tpu.memory_space<vmem>>, vector<2x32xf32>,
    %c0_16 = arith.constant 0 : index
    %c0_17 = arith.constant 0 : index
    %69 = vector.load %arg3[%c0_16, %c0_17] : memref<32x32xf32, #tpu.memory_space<vmem>>, vector<32x32xf32>
    %cst_18 = arith.constant dense<0.000000e+00> : vector<2x32xf32>
    %70 = tpu.matmul %33, %69, %cst_18 {dimension_numbers = #tpu.dot_dimension_numbers<[1], [1], [0], [0], [0, 0, 1, 0], [], []>} : vector<2x32xf32>, vector<32x32xf32>, vector<2x32xf32> -> vector<2x32xf32>
    %cst_19 = arith.constant dense<0.000000e+00> : vector<32xf32>
    %71 = vector.multi_reduction <add>, %70, %cst_19 [0] : vector<2x32xf32> to vector<32xf32>
    %72 = vector.shape_cast %71 : vector<32xf32> to vector<1x32xf32>
    %cst_20 = arith.constant 2.000000e+00 : f32
    %73 = vector.broadcast %cst_20 : f32 to vector<1x32xf32>
    %74 = arith.divf %72, %73 : vector<1x32xf32>
    %75 = vector.broadcast %74 : vector<1x32xf32> to vector<2x32xf32>
    %76 = arith.subf %70, %75 : vector<2x32xf32>
    %77 = arith.mulf %76, %76 : vector<2x32xf32>
    %cst_21 = arith.constant dense<0.000000e+00> : vector<32xf32>
    %78 = vector.multi_reduction <add>, %77, %cst_21 [0] : vector<2x32xf32> to vector<32xf32>
    %79 = vector.shape_cast %78 : vector<32xf32> to vector<1x32xf32>
    %cst_22 = arith.constant 2.000000e+00 : f32
    %80 = vector.broadcast %cst_22 : f32 to vector<1x32xf32>
    %81 = arith.divf %79, %80 : vector<1x32xf32>
    %82 = vector.broadcast %74 : vector<1x32xf32> to vector<2x32xf32>
    %83 = arith.subf %70, %82 : vector<2x32xf32>
    %cst_23 = arith.constant 9.99999974E-6 : f32
    %84 = vector.broadcast %cst_23 : f32 to vector<1x32xf32>
    %85 = arith.addf %81, %84 : vector<1x32xf32>
    %86 = math.rsqrt %85 : vector<1x32xf32>
    %87 = vector.broadcast %86 : vector<1x32xf32> to vector<2x32xf32>
    %88 = arith.mulf %83, %87 : vector<2x32xf32>
    %c0_24 = arith.constant 0 : index
    %c0_25 = arith.constant 0 : index
    %89 = vector.load %arg4[%c0_24, %c0_25] : memref<1x32xf32, #tpu.memory_space<vmem>>, vector<1x32xf32>
    %90 = vector.broadcast %89 : vector<1x32xf32> to vector<2x32xf32>
    %91 = arith.mulf %88, %90 : vector<2x32xf32>
    %c0_26 = arith.constant 0 : index
    %c0_27 = arith.constant 0 : index
    %92 = vector.load %arg5[%c0_26, %c0_27] : memref<1x32xf32, #tpu.memory_space<vmem>>, vector<1x32xf32>
    %93 = vector.broadcast %92 : vector<1x32xf32> to vector<2x32xf32>
    %94 = arith.addf %91, %93 : vector<2x32xf32>
    %cst_28 = arith.constant 0.000000e+00 : f32
    %95 = vector.broadcast %cst_28 : f32 to vector<2x32xf32>
    %96 = arith.maximumf %94, %95 : vector<2x32xf32>
    %c0_29 = arith.constant 0 : index
    %c0_30 = arith.constant 0 : index
    %97 = vector.load %arg6[%c0_29, %c0_30] : memref<16x32xf32, #tpu.memory_space<vmem>>, vector<16x32xf32>
    %cst_31 = arith.constant dense<0.000000e+00> : vector<2x16xf32>
    %98 = tpu.matmul %96, %97, %cst_31 {dimension_numbers = #tpu.dot_dimension_numbers<[1], [1], [0], [0], [0, 0, 1, 0], [], []>} : vector<2x32xf32>, vector<16x32xf32>, vector<2x16xf32> -> vector<2x16xf32>
    %cst_32 = arith.constant dense<0.000000e+00> : vector<16xf32>
    %99 = vector.multi_reduction <add>, %98, %cst_32 [0] : vector<2x16xf32> to vector<16xf32>
    %100 = vector.shape_cast %99 : vector<16xf32> to vector<1x16xf32>
    %cst_33 = arith.constant 2.000000e+00 : f32
    %101 = vector.broadcast %cst_33 : f32 to vector<1x16xf32>
    %102 = arith.divf %100, %101 : vector<1x16xf32>
    %103 = vector.broadcast %102 : vector<1x16xf32> to vector<2x16xf32>
    %104 = arith.subf %98, %103 : vector<2x16xf32>
    %105 = arith.mulf %104, %104 : vector<2x16xf32>
    %cst_34 = arith.constant dense<0.000000e+00> : vector<16xf32>
    %106 = vector.multi_reduction <add>, %105, %cst_34 [0] : vector<2x16xf32> to vector<16xf32>
    %107 = vector.shape_cast %106 : vector<16xf32> to vector<1x16xf32>
    %cst_35 = arith.constant 2.000000e+00 : f32
    %108 = vector.broadcast %cst_35 : f32 to vector<1x16xf32>
    %109 = arith.divf %107, %108 : vector<1x16xf32>
    %110 = vector.broadcast %102 : vector<1x16xf32> to vector<2x16xf32>
    %111 = arith.subf %98, %110 : vector<2x16xf32>
    %cst_36 = arith.constant 9.99999974E-6 : f32
    %112 = vector.broadcast %cst_36 : f32 to vector<1x16xf32>
    %113 = arith.addf %109, %112 : vector<1x16xf32>
    %114 = math.rsqrt %113 : vector<1x16xf32>
    %115 = vector.broadcast %114 : vector<1x16xf32> to vector<2x16xf32>
    %116 = arith.mulf %111, %115 : vector<2x16xf32>
    %c0_37 = arith.constant 0 : index
    %c0_38 = arith.constant 0 : index
    %117 = vector.load %arg7[%c0_37, %c0_38] : memref<1x16xf32, #tpu.memory_space<vmem>>, vector<1x16xf32>
    %118 = vector.broadcast %117 : vector<1x16xf32> to vector<2x16xf32>
    %119 = arith.mulf %116, %118 : vector<2x16xf32>
    %c0_39 = arith.constant 0 : index
    %c0_40 = arith.constant 0 : index
    %120 = vector.load %arg8[%c0_39, %c0_40] : memref<1x16xf32, #tpu.memory_space<vmem>>, vector<1x16xf32>
    %121 = vector.broadcast %120 : vector<1x16xf32> to vector<2x16xf32>
    %122 = arith.addf %119, %121 : vector<2x16xf32>
    %c0_41 = arith.constant 0 : index
    %c0_42 = arith.constant 0 : index
    %123 = vector.load %arg11[%c0_41, %c0_42] : memref<2x16xf32, #tpu.memory_space<vmem>>, vector<2x16xf32>
    tpu.vector_store %arg11[%c0_41, %c0_42], %122 {strides = array<i32>} : memref<2x16xf32, #tpu.memory_space<vmem>>, vector<2x16xf32>,
    %c0_43 = arith.constant 0 : index
    %c0_44 = arith.constant 0 : index
    %124 = vector.load %arg3[%c0_43, %c0_44] : memref<32x32xf32, #tpu.memory_space<vmem>>, vector<32x32xf32>
    %cst_45 = arith.constant dense<0.000000e+00> : vector<2x32xf32>
    %125 = tpu.matmul %66, %124, %cst_45 {dimension_numbers = #tpu.dot_dimension_numbers<[1], [1], [0], [0], [0, 0, 1, 0], [], []>} : vector<2x32xf32>, vector<32x32xf32>, vector<2x32xf32> -> vector<2x32xf32>
    %cst_46 = arith.constant dense<0.000000e+00> : vector<32xf32>
    %126 = vector.multi_reduction <add>, %125, %cst_46 [0] : vector<2x32xf32> to vector<32xf32>
    %127 = vector.shape_cast %126 : vector<32xf32> to vector<1x32xf32>
    %cst_47 = arith.constant 2.000000e+00 : f32
    %128 = vector.broadcast %cst_47 : f32 to vector<1x32xf32>
    %129 = arith.divf %127, %128 : vector<1x32xf32>
    %130 = vector.broadcast %129 : vector<1x32xf32> to vector<2x32xf32>
    %131 = arith.subf %125, %130 : vector<2x32xf32>
    %132 = arith.mulf %131, %131 : vector<2x32xf32>
    %cst_48 = arith.constant dense<0.000000e+00> : vector<32xf32>
    %133 = vector.multi_reduction <add>, %132, %cst_48 [0] : vector<2x32xf32> to vector<32xf32>
    %134 = vector.shape_cast %133 : vector<32xf32> to vector<1x32xf32>
    %cst_49 = arith.constant 2.000000e+00 : f32
    %135 = vector.broadcast %cst_49 : f32 to vector<1x32xf32>
    %136 = arith.divf %134, %135 : vector<1x32xf32>
    %137 = vector.broadcast %129 : vector<1x32xf32> to vector<2x32xf32>
    %138 = arith.subf %125, %137 : vector<2x32xf32>
    %cst_50 = arith.constant 9.99999974E-6 : f32
    %139 = vector.broadcast %cst_50 : f32 to vector<1x32xf32>
    %140 = arith.addf %136, %139 : vector<1x32xf32>
    %141 = math.rsqrt %140 : vector<1x32xf32>
    %142 = vector.broadcast %141 : vector<1x32xf32> to vector<2x32xf32>
    %143 = arith.mulf %138, %142 : vector<2x32xf32>
    %c0_51 = arith.constant 0 : index
    %c0_52 = arith.constant 0 : index
    %144 = vector.load %arg4[%c0_51, %c0_52] : memref<1x32xf32, #tpu.memory_space<vmem>>, vector<1x32xf32>
    %145 = vector.broadcast %144 : vector<1x32xf32> to vector<2x32xf32>
    %146 = arith.mulf %143, %145 : vector<2x32xf32>
    %c0_53 = arith.constant 0 : index
    %c0_54 = arith.constant 0 : index
    %147 = vector.load %arg5[%c0_53, %c0_54] : memref<1x32xf32, #tpu.memory_space<vmem>>, vector<1x32xf32>
    %148 = vector.broadcast %147 : vector<1x32xf32> to vector<2x32xf32>
    %149 = arith.addf %146, %148 : vector<2x32xf32>
    %cst_55 = arith.constant 0.000000e+00 : f32
    %150 = vector.broadcast %cst_55 : f32 to vector<2x32xf32>
    %151 = arith.maximumf %149, %150 : vector<2x32xf32>
    %c0_56 = arith.constant 0 : index
    %c0_57 = arith.constant 0 : index
    %152 = vector.load %arg6[%c0_56, %c0_57] : memref<16x32xf32, #tpu.memory_space<vmem>>, vector<16x32xf32>
    %cst_58 = arith.constant dense<0.000000e+00> : vector<2x16xf32>
    %153 = tpu.matmul %151, %152, %cst_58 {dimension_numbers = #tpu.dot_dimension_numbers<[1], [1], [0], [0], [0, 0, 1, 0], [], []>} : vector<2x32xf32>, vector<16x32xf32>, vector<2x16xf32> -> vector<2x16xf32>
    %cst_59 = arith.constant dense<0.000000e+00> : vector<16xf32>
    %154 = vector.multi_reduction <add>, %153, %cst_59 [0] : vector<2x16xf32> to vector<16xf32>
    %155 = vector.shape_cast %154 : vector<16xf32> to vector<1x16xf32>
    %cst_60 = arith.constant 2.000000e+00 : f32
    %156 = vector.broadcast %cst_60 : f32 to vector<1x16xf32>
    %157 = arith.divf %155, %156 : vector<1x16xf32>
    %158 = vector.broadcast %157 : vector<1x16xf32> to vector<2x16xf32>
    %159 = arith.subf %153, %158 : vector<2x16xf32>
    %160 = arith.mulf %159, %159 : vector<2x16xf32>
    %cst_61 = arith.constant dense<0.000000e+00> : vector<16xf32>
    %161 = vector.multi_reduction <add>, %160, %cst_61 [0] : vector<2x16xf32> to vector<16xf32>
    %162 = vector.shape_cast %161 : vector<16xf32> to vector<1x16xf32>
    %cst_62 = arith.constant 2.000000e+00 : f32
    %163 = vector.broadcast %cst_62 : f32 to vector<1x16xf32>
    %164 = arith.divf %162, %163 : vector<1x16xf32>
    %165 = vector.broadcast %157 : vector<1x16xf32> to vector<2x16xf32>
    %166 = arith.subf %153, %165 : vector<2x16xf32>
    %cst_63 = arith.constant 9.99999974E-6 : f32
    %167 = vector.broadcast %cst_63 : f32 to vector<1x16xf32>
    %168 = arith.addf %164, %167 : vector<1x16xf32>
    %169 = math.rsqrt %168 : vector<1x16xf32>
    %170 = vector.broadcast %169 : vector<1x16xf32> to vector<2x16xf32>
    %171 = arith.mulf %166, %170 : vector<2x16xf32>
    %c0_64 = arith.constant 0 : index
    %c0_65 = arith.constant 0 : index
    %172 = vector.load %arg7[%c0_64, %c0_65] : memref<1x16xf32, #tpu.memory_space<vmem>>, vector<1x16xf32>
    %173 = vector.broadcast %172 : vector<1x16xf32> to vector<2x16xf32>
    %174 = arith.mulf %171, %173 : vector<2x16xf32>
    %c0_66 = arith.constant 0 : index
    %c0_67 = arith.constant 0 : index
    %175 = vector.load %arg8[%c0_66, %c0_67] : memref<1x16xf32, #tpu.memory_space<vmem>>, vector<1x16xf32>
    %176 = vector.broadcast %175 : vector<1x16xf32> to vector<2x16xf32>
    %177 = arith.addf %174, %176 : vector<2x16xf32>
    %c0_68 = arith.constant 0 : index
    %c0_69 = arith.constant 0 : index
    %178 = vector.load %arg12[%c0_68, %c0_69] : memref<2x16xf32, #tpu.memory_space<vmem>>, vector<2x16xf32>
    tpu.vector_store %arg12[%c0_68, %c0_69], %177 {strides = array<i32>} : memref<2x16xf32, #tpu.memory_space<vmem>>, vector<2x16xf32>,
    return
  }
}

</mosaic_0001>

<bundles_post_ra>
// kernel: simclr_forward.1
= control target key start
LH: loop header
LB: loop body
LE: loop exit
PB: predicated region body
PF: predicated region fallthrough
CT: control target
= control target key end

     0   :  { %18 = vsyncpa [#allocation3], 0  ;;  %s2269_s0 = inlined_call_operand.vmem [shape: f32[2,4,256], index: 0, kind: input, shape index: {}]   ;;  %s2270_s1 = inlined_call_operand.vmem [shape: f32[2,4,256], index: 1, kind: input, shape index: {}]   ;;  %s2271_s2 = inlined_call_operand.vmem [shape: f32[32,4], index: 2, kind: input, shape index: {}]   ;;  %s2272_s3 = inlined_call_operand.vmem [shape: f32[32,32], index: 3, kind: input, shape index: {}]   ;;  %s2273_s4 = inlined_call_operand.vmem [shape: f32[1,32], index: 4, kind: input, shape index: {}]   ;;  %s2274_s5 = inlined_call_operand.vmem [shape: f32[1,32], index: 5, kind: input, shape index: {}]   ;;  %s2275_s6 = inlined_call_operand.vmem [shape: f32[16,32], index: 6, kind: input, shape index: {}]   ;;  %s2276_s7 = inlined_call_operand.vmem [shape: f32[1,16], index: 7, kind: input, shape index: {}]   ;;  %s2277_s8 = inlined_call_operand.vmem [shape: f32[1,16], index: 8, kind: input, shape index: {}]   ;;  %s2278_s9 = inlined_call_operand.hbm [shape: f32[2,32], index: 9, kind: output, shape index: {0}]   ;;  %s2279_s10 = inlined_call_operand.hbm [shape: f32[2,32], index: 10, kind: output, shape index: {1}]   ;;  %s2280_s11 = inlined_call_operand.hbm [shape: f32[2,16], index: 11, kind: output, shape index: {2}]   ;;  %s2281_s12 = inlined_call_operand.hbm [shape: f32[2,16], index: 12, kind: output, shape index: {3}]  }
   0x1   :  { %19 = vsyncpa [#allocation5], 0  ;;  %v39_v0 = vld [vmem:[%s2271_s2] sm:$0xff]  ;;  %v1570_v1 = vmov 1   ;;  %v1571_v2 = vmov 0  }
   0x2   :  { %1471 = vset.pattern.permute.xlu1 %v1570_v1  ;;  %1470 = vset.pattern.permute.xlu0 %v1571_v2 }
   0x3   :  { %120 = vperm.xlu1 %1471, %v39_v0   ;;  %47 = vperm.xlu0 %1470, %v39_v0  }
   0x4   :  { %20 = vsyncpa [#allocation8], 0  ;;  %v40_v3 = vld [vmem:[%s2271_s2 + $0x8] sm:$0xff]  ;;  %v41_v4 = vld [vmem:[%s2271_s2 + $0x10] sm:$0xff]  ;;  %v1572_v6 = vmov 2   ;;  %v1573_v7 = vmov 3   ;;  %v2282_v8 = vlaneseq }
   0x5   :  { %v42_v5 = vld [vmem:[%s2271_s2 + $0x18] sm:$0xff]  ;;  %v1665_v12 = vld [vmem:[%s2269_s0] sm:$0xff]  ;;  %v1678_v17 = vld [vmem:[%s2269_s0 + $0x8] sm:$0xff]  ;;  %vm840_vm0 = vcmask 261120   ;;  %vm1575_vm1 = vmmov 0   ;;  %vm747_vm2 = vcmask 130112  }
   0x6   :  { %v1658_v9 = vshrl.u32 %v2282_v8, 7  ;;  %v420_v20 = vld [vmem:[%s2270_s1] sm:$0xff]  ;;  %v421_v45 = vld [vmem:[%s2270_s1 + $0x8] sm:$0xff]  ;;  %vm754_vm3 = vcmask 195712   ;;  %vm761_vm4 = vcmask 261312   ;;  %vm782_vm5 = vcmask 1041409  }
   0x7   :  { %124 = vperm.xlu1 %1471, %v40_v3   ;;  %52 = vperm.xlu0 %1470, %v40_v3   ;;  %vm785_vm6 = vcmask 254976   ;;  %vm1045_vm7 = vcmask 123904  }
   0x8   :  { %2318 = vst [vmem:[#allocation12_spill] sm:$0xff] %v1658_v9  ;;  %v69_v10 = vsub.s32 0, %v1658_v9  ;;  %v73_v11 = vsub.s32 4, %v1658_v9  ;;  %v1668_v13 = vsub.s32 1, %v1658_v9  ;;  %v1671_v14 = vsub.s32 5, %v1658_v9 }
   0x9   :  { %v1681_v18 = vsub.s32 2, %v1658_v9  ;;  %v1684_v19 = vsub.s32 6, %v1658_v9  ;;  %v305_v41 = vsub.s32 3, %v1658_v9  ;;  %v309_v42 = vsub.s32 7, %v1658_v9 }
   0xa   :  { %v70_v15 = vrot.slane %v1665_v12, %v69_v10  ;;  %v74_v16 = vrot.slane %v1665_v12, %v73_v11  ;;  %v138_v21 = vrot.slane %v1665_v12, %v1668_v13  ;;  %v142_v22 = vrot.slane %v1665_v12, %v1671_v14 }
   0xb   :  { %128 = vperm.xlu1 %1471, %v41_v4   ;;  %57 = vperm.xlu0 %1470, %v41_v4   ;;  %v78_v23 = vrot.slane %v1678_v17, %v69_v10  ;;  %v82_v24 = vrot.slane %v1678_v17, %v73_v11  ;;  %v146_v27 = vrot.slane %v1678_v17, %v1668_v13 }
   0xc   :  { %v1695_v25 = vrot.slane %v70_v15, %v69_v10  ;;  %v1697_v26 = vrot.slane %v74_v16, %v69_v10  ;;  %v150_v28 = vrot.slane %v1678_v17, %v1671_v14  ;;  %v222_v29 = vrot.slane %v1665_v12, %v1681_v18 }
   0xd   :  { %v226_v30 = vrot.slane %v1665_v12, %v1684_v19  ;;  %v427_v31 = vrot.slane %v420_v20, %v69_v10  ;;  %v431_v32 = vrot.slane %v420_v20, %v73_v11  ;;  %v230_v33 = vrot.slane %v1678_v17, %v1681_v18 }
   0xe   :  { %v234_v34 = vrot.slane %v1678_v17, %v1684_v19  ;;  %v479_v35 = vrot.slane %v420_v20, %v1668_v13  ;;  %v483_v36 = vrot.slane %v420_v20, %v1671_v14  ;;  %v1714_v37 = vrot.slane %v138_v21, %v1668_v13 }
   0xf   :  { %132 = vperm.xlu1 %1471, %v42_v5   ;;  %62 = vperm.xlu0 %1470, %v42_v5   ;;  %v1717_v38 = vrot.slane %v142_v22, %v1668_v13  ;;  %v1719_v39 = vrot.slane %v78_v23, %v69_v10  ;;  %v1721_v40 = vrot.slane %v82_v24, %v69_v10 }
  0x10   :  { %v1726_v43 = vrot.slane %v146_v27, %v1668_v13  ;;  %v1729_v44 = vrot.slane %v150_v28, %v1668_v13  ;;  %v1735_v46 = vrot.slane %v222_v29, %v1681_v18  ;;  %v1738_v47 = vrot.slane %v226_v30, %v1681_v18 }
  0x11   :  { %v1740_v48 = vrot.slane %v427_v31, %v69_v10  ;;  %v1742_v49 = vrot.slane %v431_v32, %v69_v10  ;;  %v1745_v50 = vrot.slane %v230_v33, %v1681_v18  ;;  %v1748_v51 = vrot.slane %v234_v34, %v1681_v18 }
  0x12   :  { %v1751_v52 = vrot.slane %v479_v35, %v1668_v13  ;;  %v1754_v53 = vrot.slane %v483_v36, %v1668_v13  ;;  %v547_v54 = vrot.slane %v420_v20, %v1681_v18  ;;  %v435_v55 = vrot.slane %v421_v45, %v69_v10 }
  0x13   :  { %1473 = vset.pattern.permute.xlu1 %v1572_v6  ;;  %1472 = vset.pattern.permute.xlu0 %v1572_v6  ;;  %2319 = vst [vmem:[#allocation13_spill] sm:$0xff] %v1740_v48  ;;  %2320 = vst [vmem:[#allocation14_spill] sm:$0xff] %v1742_v49  ;;  %v439_v56 = vrot.slane %v421_v45, %v73_v11  ;;  %v487_v57 = vrot.slane %v421_v45, %v1668_v13 }
  0x14   :  { %208 = vperm.xlu1 %1473, %v40_v3   ;;  %204 = vperm.xlu0 %1472, %v39_v0   ;;  %2321 = vst [vmem:[#allocation15_spill] sm:$0xff] %v1751_v52  ;;  %2322 = vst [vmem:[#allocation16_spill] sm:$0xff] %v1754_v53  ;;  %v306_v58 = vrot.slane %v1665_v12, %v305_v41  ;;  %v310_v59 = vrot.slane %v1665_v12, %v309_v42 }
  0x15   :  { %v551_v60 = vrot.slane %v420_v20, %v1684_v19  ;;  %v491_v61 = vrot.slane %v421_v45, %v1671_v14  ;;  %v314_v62 = vrot.slane %v1678_v17, %v305_v41  ;;  %v318_v63 = vrot.slane %v1678_v17, %v309_v42 }
  0x16   :  { %v619_v1 = vrot.slane %v420_v20, %v309_v42  ;;  %v555_v2 = vrot.slane %v421_v45, %v1681_v18  ;;  %v1767_v6 = vrot.slane %v547_v54, %v1681_v18  ;;  %v1771_v11 = vrot.slane %v439_v56, %v69_v10 }
  0x17   :  { %v1774_v12 = vrot.slane %v487_v57, %v1668_v13  ;;  %v1776_v14 = vrot.slane %v306_v58, %v305_v41  ;;  %v1778_v15 = vrot.slane %v310_v59, %v305_v41  ;;  %v1781_v16 = vrot.slane %v551_v60, %v1681_v18 }
  0x18   :  { %212 = vperm.xlu1 %1473, %v41_v4   ;;  %216 = vperm.xlu0 %1472, %v42_v5   ;;  %2324 = vst [vmem:[#allocation18_spill] sm:$0xff] %v1771_v11  ;;  %v1784_v17 = vrot.slane %v491_v61, %v1668_v13  ;;  %v1795_v24 = vrot.slane %v555_v2, %v1681_v18 }
  0x19   :  { %2325 = vst [vmem:[#allocation19_spill] sm:$0xff] %v1774_v12 }
  0x1a   :  { %2326 = vst [vmem:[#allocation20_spill] sm:$0xff] %v1784_v17  ;;  %2327 = vst [vmem:[#allocation21_spill] sm:$0xff] %v1795_v24 }
  0x1c   :  { %1474 = vset.pattern.permute.xlu1 %v1573_v7  ;;  %1475 = vset.pattern.permute.xlu0 %v1573_v7  ;;  %v1769_v7 = vrot.slane %v435_v55, %v69_v10  ;;  %v1792_v10 = vrot.slane %v619_v1, %v305_v41 }
  0x1d   :  { %288 = vperm.xlu1 %1474, %v39_v0   ;;  %292 = vperm.xlu0 %1475, %v40_v3   ;;  %v615_v0 = vrot.slane %v420_v20, %v305_v41  ;;  %v559_v3 = vrot.slane %v421_v45, %v1684_v19  ;;  %v1786_v19 = vrot.slane %v314_v62, %v305_v41 }
  0x1e   :  { %2323 = vst [vmem:[#allocation17_spill] sm:$0xff] %v1769_v7  ;;  %v1788_v20 = vrot.slane %v318_v63, %v305_v41 }
  0x1f   :  { %v1790_v21 = vrot.slane %v615_v0, %v305_v41  ;;  %v1798_v27 = vrot.slane %v559_v3, %v1681_v18 }
  0x21   :  { %296 = vperm.xlu1 %1474, %v41_v4   ;;  %v623_v4 = vrot.slane %v421_v45, %v305_v41  ;;  %2328 = vst [vmem:[#allocation22_spill] sm:$0xff] %v1798_v27 }
  0x23   :  { %v1800_v28 = vrot.slane %v623_v4, %v305_v41 }
  0x25   :  { %300 = vperm.xlu1 %1474, %v42_v5   ;;  %v627_v5 = vrot.slane %v421_v45, %v309_v42 }
  0x27   :  { %v1802_v13 = vrot.slane %v627_v5, %v305_v41 }
  0x29   :  { %2329 = vst [vmem:[#allocation23_spill] sm:$0xff] %v1802_v13 }
  0x7e   :  { %v121_v22 = vpop.permute.xlu1 %120  ;;  %v48_v23 = vpop.permute.xlu0 %47 }
  0x7f   :  { %v103_v29 = vmul.f32 %v1695_v25, %v48_v23  ;;  %v104_v30 = vmul.f32 %v1697_v26, %v48_v23  ;;  %v171_v31 = vmul.f32 %v1714_v37, %v121_v22  ;;  %v172_v32 = vmul.f32 %v1717_v38, %v121_v22 }
  0x80   :  { %v111_v33 = vmul.f32 %v1719_v39, %v48_v23  ;;  %v112_v34 = vmul.f32 %v1721_v40, %v48_v23  ;;  %v179_v35 = vmul.f32 %v1726_v43, %v121_v22  ;;  %v180_v18 = vmul.f32 %v1729_v44, %v121_v22 }
  0x81   :  { %v1812_v36 = vadd.f32 %v171_v31, %v103_v29  ;;  %v1814_v41 = vadd.f32 %v172_v32, %v104_v30  ;;  %v460_v42 = vmul.f32 %v1740_v48, %v48_v23  ;;  %v461_v45 = vmul.f32 %v1742_v49, %v48_v23 }
  0x82   :  { %v1818_v54 = vpop.permute.xlu1 %124  ;;  %v1820_v55 = vpop.permute.xlu0 %52  ;;  %v1822_v56 = vadd.f32 %v179_v35, %v111_v33  ;;  %v1824_v57 = vadd.f32 %v180_v18, %v112_v34  ;;  %v512_v58 = vmul.f32 %v1751_v52, %v121_v22  ;;  %v513_v59 = vmul.f32 %v1754_v53, %v121_v22 }
  0x83   :  { %2330 = vst [vmem:[#allocation24_spill] sm:$0xff] %v1818_v54  ;;  %2331 = vst [vmem:[#allocation25_spill] sm:$0xff] %v1820_v55  ;;  %v105_v60 = vmul.f32 %v1695_v25, %v1820_v55  ;;  %v106_v61 = vmul.f32 %v1697_v26, %v1820_v55  ;;  %v173_v62 = vmul.f32 %v1714_v37, %v1818_v54 }
  0x84   :  { %v174_v63 = vmul.f32 %v1717_v38, %v1818_v54  ;;  %v113_v0 = vmul.f32 %v1719_v39, %v1820_v55  ;;  %v114_v1 = vmul.f32 %v1721_v40, %v1820_v55  ;;  %v181_v2 = vmul.f32 %v1726_v43, %v1818_v54 }
  0x85   :  { %v182_v3 = vmul.f32 %v1729_v44, %v1818_v54  ;;  %v189_v4 = vadd.f32 %v173_v62, %v105_v60  ;;  %v1844_v29 = vadd.f32 %v512_v58, %v460_v42  ;;  %v1846_v30 = vadd.f32 %v513_v59, %v461_v45 }
  0x86   :  { %v190_v5 = vadd.f32 %v174_v63, %v106_v61  ;;  %v1848_v31 = vpop.permute.xlu1 %128  ;;  %v1850_v32 = vpop.permute.xlu0 %57  ;;  %v197_v33 = vadd.f32 %v181_v2, %v113_v0  ;;  %v468_v35 = vmul.f32 %v1769_v7, %v48_v23  ;;  %v469_v18 = vmul.f32 %v1771_v11, %v48_v23 }
  0x87   :  { %2332 = vst [vmem:[#allocation26_spill] sm:$0xff] %v1848_v31  ;;  %2333 = vst [vmem:[#allocation27_spill] sm:$0xff] %v1850_v32  ;;  %v198_v34 = vadd.f32 %v182_v3, %v114_v1  ;;  %v107_v8 = vmul.f32 %v1695_v25, %v1850_v32  ;;  %v108_v60 = vmul.f32 %v1697_v26, %v1850_v32 }
  0x88   :  { %v175_v42 = vmul.f32 %v1714_v37, %v1848_v31  ;;  %v176_v45 = vmul.f32 %v1717_v38, %v1848_v31  ;;  %v115_v58 = vmul.f32 %v1719_v39, %v1850_v32  ;;  %v116_v59 = vmul.f32 %v1721_v40, %v1850_v32 }
  0x89   :  { %v183_v23 = vmul.f32 %v1726_v43, %v1848_v31  ;;  %v184_v61 = vmul.f32 %v1729_v44, %v1848_v31  ;;  %v520_v0 = vmul.f32 %v1774_v12, %v121_v22  ;;  %v521_v1 = vmul.f32 %v1784_v17, %v121_v22 }
  0x8a   :  { %v191_v62 = vadd.f32 %v175_v42, %v107_v8  ;;  %v192_v63 = vadd.f32 %v176_v45, %v108_v60  ;;  %v1872_v2 = vpop.permute.xlu1 %132  ;;  %v1874_v3 = vpop.permute.xlu0 %62  ;;  %v1878_v7 = vmul.f32 %v1740_v48, %v1820_v55  ;;  %v1882_v13 = vmul.f32 %v1742_v49, %v1820_v55 }
  0x8b   :  { %2334 = vst [vmem:[#allocation28_spill] sm:$0xff] %v1872_v2  ;;  %2335 = vst [vmem:[#allocation29_spill] sm:$0xff] %v1874_v3  ;;  %v199_v9 = vadd.f32 %v183_v23, %v115_v58  ;;  %v200_v11 = vadd.f32 %v184_v61, %v116_v59  ;;  %v109_v8 = vmul.f32 %v1695_v25, %v1874_v3 }
  0x8c   :  { %v110_v22 = vmul.f32 %v1697_v26, %v1874_v3  ;;  %v177_v60 = vmul.f32 %v1714_v37, %v1872_v2  ;;  %v178_v42 = vmul.f32 %v1717_v38, %v1872_v2  ;;  %v117_v45 = vmul.f32 %v1719_v39, %v1874_v3 }
  0x8d   :  { %v118_v58 = vmul.f32 %v1721_v40, %v1874_v3  ;;  %v185_v59 = vmul.f32 %v1726_v43, %v1872_v2  ;;  %v186_v25 = vmul.f32 %v1729_v44, %v1872_v2  ;;  %v1900_v61 = vadd.f32 %v520_v0, %v468_v35 }
  0x8e   :  { %v193_v23 = vadd.f32 %v177_v60, %v109_v8  ;;  %v194_v26 = vadd.f32 %v178_v42, %v110_v22  ;;  %v1902_v37 = vadd.f32 %v521_v1, %v469_v18  ;;  %v1910_v39 = vmul.f32 %v1751_v52, %v1818_v54 }
  0x8f   :  { %v1904_v17 = vadd.f32 %v185_v59, %v117_v45  ;;  %v1906_v38 = vadd.f32 %v186_v25, %v118_v58  ;;  %v1914_v40 = vmul.f32 %v1754_v53, %v1818_v54  ;;  %v1916_v43 = vpop.permute.xlu1 %208  ;;  %v205_v44 = vpop.permute.xlu0 %204  ;;  %v1920_v35 = vmul.f32 %v1740_v48, %v1850_v32 }
  0x90   :  { %v1924_v18 = vmul.f32 %v1742_v49, %v1850_v32  ;;  %v1928_v0 = vmul.f32 %v1751_v52, %v1848_v31  ;;  %v1932_v1 = vmul.f32 %v1754_v53, %v1848_v31  ;;  %v255_v8 = vmul.f32 %v1735_v46, %v205_v44 }
  0x91   :  { %2336 = vst [vmem:[#allocation30_spill] sm:$0xff] %v1920_v35  ;;  %v256_v22 = vmul.f32 %v1738_v47, %v205_v44  ;;  %v257_v60 = vmul.f32 %v1735_v46, %v1916_v43  ;;  %v258_v42 = vmul.f32 %v1738_v47, %v1916_v43  ;;  %v263_v45 = vmul.f32 %v1745_v50, %v205_v44 }
  0x92   :  { %2337 = vst [vmem:[#allocation31_spill] sm:$0xff] %v1924_v18  ;;  %2338 = vst [vmem:[#allocation32_spill] sm:$0xff] %v1928_v0  ;;  %v264_v58 = vmul.f32 %v1748_v51, %v205_v44  ;;  %v265_v59 = vmul.f32 %v1745_v50, %v1916_v43  ;;  %v266_v25 = vmul.f32 %v1748_v51, %v1916_v43 }
  0x93   :  { %2339 = vst [vmem:[#allocation33_spill] sm:$0xff] %v1932_v1  ;;  %v271_v31 = vadd.f32 %v255_v8, %v1812_v36  ;;  %v272_v32 = vadd.f32 %v256_v22, %v1814_v41  ;;  %v273_v53 = vadd.f32 %v257_v60, %v189_v4  ;;  %v274_v52 = vadd.f32 %v258_v42, %v190_v5  ;;  %v1948_v2 = vpop.permute.xlu1 %212  ;;  %v1950_v49 = vpop.permute.xlu0 %216 }
  0x94   :  { %2340 = vst [vmem:[#allocation34_spill] sm:$0xff] %v1948_v2  ;;  %2341 = vst [vmem:[#allocation35_spill] sm:$0xff] %v1950_v49  ;;  %v279_v48 = vadd.f32 %v263_v45, %v1822_v56  ;;  %v280_v3 = vadd.f32 %v264_v58, %v1824_v57  ;;  %v281_v12 = vadd.f32 %v265_v59, %v197_v33 }
  0x95   :  { %v282_v54 = vadd.f32 %v266_v25, %v198_v34  ;;  %v259_v55 = vmul.f32 %v1735_v46, %v1948_v2  ;;  %v260_v36 = vmul.f32 %v1738_v47, %v1948_v2  ;;  %v261_v41 = vmul.f32 %v1735_v46, %v1950_v49 }
  0x96   :  { %v262_v4 = vmul.f32 %v1738_v47, %v1950_v49  ;;  %v267_v5 = vmul.f32 %v1745_v50, %v1948_v2  ;;  %v268_v56 = vmul.f32 %v1748_v51, %v1948_v2  ;;  %v580_v57 = vmul.f32 %v1767_v6, %v205_v44 }
  0x97   :  { %v581_v33 = vmul.f32 %v1781_v16, %v205_v44  ;;  %v275_v34 = vadd.f32 %v259_v55, %v191_v62  ;;  %v276_v8 = vadd.f32 %v260_v36, %v192_v63  ;;  %v277_v22 = vadd.f32 %v261_v41, %v193_v23 }
  0x98   :  { %v278_v60 = vadd.f32 %v262_v4, %v194_v26  ;;  %v283_v42 = vadd.f32 %v267_v5, %v199_v9  ;;  %v284_v45 = vadd.f32 %v268_v56, %v200_v11  ;;  %v596_v46 = vadd.f32 %v580_v57, %v1844_v29  ;;  %v1970_v58 = vpop.permute.xlu1 %288  ;;  %v1972_v59 = vpop.permute.xlu0 %292 }
  0x99   :  { %v597_v47 = vadd.f32 %v581_v33, %v1846_v30  ;;  %v269_v25 = vmul.f32 %v1745_v50, %v1950_v49  ;;  %v270_v2 = vmul.f32 %v1748_v51, %v1950_v49  ;;  %v1979_v55 = vmul.f32 %v1795_v24, %v205_v44 }
  0x9a   :  { %v1982_v9 = vmul.f32 %v1798_v27, %v205_v44  ;;  %v339_v11 = vmul.f32 %v1776_v14, %v1970_v58  ;;  %v340_v29 = vmul.f32 %v1778_v15, %v1970_v58  ;;  %v341_v30 = vmul.f32 %v1776_v14, %v1972_v59 }
  0x9b   :  { %v342_v50 = vmul.f32 %v1778_v15, %v1972_v59  ;;  %v347_v51 = vmul.f32 %v1786_v19, %v1970_v58  ;;  %v348_v62 = vmul.f32 %v1788_v20, %v1970_v58  ;;  %v349_v63 = vmul.f32 %v1786_v19, %v1972_v59 }
  0x9c   :  { %v350_v23 = vmul.f32 %v1788_v20, %v1972_v59  ;;  %v355_v26 = vadd.f32 %v339_v11, %v271_v31  ;;  %v356_v44 = vadd.f32 %v340_v29, %v272_v32  ;;  %v357_v36 = vadd.f32 %v341_v30, %v273_v53  ;;  %v2000_v4 = vpop.permute.xlu1 %296 }
  0x9d   :  { %v358_v41 = vadd.f32 %v342_v50, %v274_v52  ;;  %v363_v5 = vadd.f32 %v347_v51, %v279_v48  ;;  %v364_v56 = vadd.f32 %v348_v62, %v280_v3  ;;  %v365_v57 = vadd.f32 %v349_v63, %v281_v12 }
  0x9e   :  { %v366_v33 = vadd.f32 %v350_v23, %v282_v54  ;;  %v371_v49 = vmax.f32 %v355_v26, 0.0  ;;  %v372_v27 = vmax.f32 %v356_v44, 0.0  ;;  %v373_v24 = vmax.f32 %v357_v36, 0.0 }
  0x9f   :  { %v374_v1 = vmax.f32 %v358_v41, 0.0  ;;  %v379_v18 = vmax.f32 %v363_v5, 0.0  ;;  %v380_v0 = vmax.f32 %v364_v56, 0.0  ;;  %v343_v35 = vmul.f32 %v1776_v14, %v2000_v4 }
  0xa0   :  { %v344_v31 = vmul.f32 %v1778_v15, %v2000_v4  ;;  %v387_v53 = vadd.f32 %v372_v27, %v371_v49  ;;  %v381_v32 = vmax.f32 %v365_v57, 0.0  ;;  %v382_v11 = vmax.f32 %v366_v33, 0.0  ;;  %v2006_v48 = vpop.permute.xlu1 %300 }
  0xa1   :  { %v390_v52 = vadd.f32 %v374_v1, %v373_v24  ;;  %v399_v12 = vadd.f32 %v380_v0, %v379_v18  ;;  %v359_v54 = vadd.f32 %v343_v35, %v275_v34  ;;  %v351_v29 = vmul.f32 %v1786_v19, %v2000_v4 }
  0xa2   :  { %v360_v3 = vadd.f32 %v344_v31, %v276_v8  ;;  %388 = vadd.xlane.f32.xlu0 %v387_v53  ;;  %v402_v30 = vadd.f32 %v382_v11, %v381_v32  ;;  %v345_v50 = vmul.f32 %v1776_v14, %v2006_v48  ;;  %v346_v49 = vmul.f32 %v1778_v15, %v2006_v48  ;;  %v2344_v11 = vld [vmem:[#allocation32_spill] sm:$0xff] }
  0xa3   :  { %391 = vadd.xlane.f32.xlu1 %v390_v52  ;;  %v375_v24 = vmax.f32 %v359_v54, 0.0  ;;  %v352_v1 = vmul.f32 %v1788_v20, %v2000_v4  ;;  %v367_v18 = vadd.f32 %v351_v29, %v283_v42  ;;  %v648_v34 = vmul.f32 %v1790_v21, %v1970_v58  ;;  %v2346_v29 = vld [vmem:[#allocation33_spill] sm:$0xff] }
  0xa4   :  { %v376_v27 = vmax.f32 %v360_v3, 0.0  ;;  %v361_v35 = vadd.f32 %v345_v50, %v277_v22  ;;  %v362_v0 = vadd.f32 %v346_v49, %v278_v60  ;;  %v649_v8 = vmul.f32 %v1792_v10, %v1970_v58  ;;  %v2345_v3 = vld [vmem:[#allocation31_spill] sm:$0xff]  ;;  %v2347_v49 = vld [vmem:[#allocation34_spill] sm:$0xff] }
  0xa5   :  { %v368_v62 = vadd.f32 %v352_v1, %v284_v45  ;;  %v383_v14 = vmax.f32 %v367_v18, 0.0  ;;  %v285_v63 = vadd.f32 %v269_v25, %v1904_v17  ;;  %v664_v26 = vadd.f32 %v648_v34, %v596_v46  ;;  %v2348_v34 = vld [vmem:[#allocation25_spill] sm:$0xff] }
  0xa6   :  { %v393_v51 = vadd.f32 %v376_v27, %v375_v24  ;;  %400 = vadd.xlane.f32.xlu0 %v399_v12  ;;  %v377_v15 = vmax.f32 %v361_v35, 0.0  ;;  %v378_v23 = vmax.f32 %v362_v0, 0.0  ;;  %v665_v44 = vadd.f32 %v649_v8, %v597_v47  ;;  %v2349_v8 = vld [vmem:[#allocation17_spill] sm:$0xff] }
  0xa7   :  { %v384_v42 = vmax.f32 %v368_v62, 0.0  ;;  %v286_v22 = vadd.f32 %v270_v2, %v1906_v38  ;;  %v353_v60 = vmul.f32 %v1786_v19, %v2006_v48  ;;  %v354_v36 = vmul.f32 %v1788_v20, %v2006_v48  ;;  %v2342_v38 = vld [vmem:[#allocation23_spill] sm:$0xff] }
  0xa8   :  { %394 = vadd.xlane.f32.xlu1 %v393_v51  ;;  %v396_v41 = vadd.f32 %v378_v23, %v377_v15  ;;  %v680_v45 = vmax.f32 %v664_v26, 0.0  ;;  %v681_v5 = vmax.f32 %v665_v44, 0.0  ;;  %v604_v17 = vadd.f32 %v1979_v55, %v1900_v61  ;;  %v2350_v15 = vld [vmem:[#allocation18_spill] sm:$0xff]  ;;  %v2351_v44 = vld [vmem:[#allocation24_spill] sm:$0xff] }
  0xa9   :  { %v405_v25 = vadd.f32 %v384_v42, %v383_v14  ;;  %v369_v56 = vadd.f32 %v353_v60, %v285_v63  ;;  %v370_v46 = vadd.f32 %v354_v36, %v286_v22  ;;  %v605_v47 = vadd.f32 %v1982_v9, %v1902_v37  ;;  %v2352_v42 = vld [vmem:[#allocation19_spill] sm:$0xff]  ;;  %v2353_v60 = vld [vmem:[#allocation20_spill] sm:$0xff] }
  0xaa   :  { %403 = vadd.xlane.f32.xlu0 %v402_v30  ;;  %v696_v2 = vadd.f32 %v681_v5, %v680_v45  ;;  %v656_v19 = vmul.f32 %v1800_v28, %v1970_v58  ;;  %v657_v20 = vmul.f32 %v2342_v38, %v1970_v58  ;;  %v530_v57 = vadd.f32 %v1910_v39, %v1878_v7  ;;  %v2343_v39 = vld [vmem:[#allocation30_spill] sm:$0xff] }
  0xab   :  { %v385_v33 = vmax.f32 %v369_v56, 0.0  ;;  %v386_v61 = vmax.f32 %v370_v46, 0.0  ;;  %v531_v55 = vadd.f32 %v1914_v40, %v1882_v13  ;;  %v582_v37 = vmul.f32 %v1767_v6, %v1916_v43 }
  0xac   :  { %397 = vadd.xlane.f32.xlu1 %v396_v41  ;;  %v672_v9 = vadd.f32 %v656_v19, %v604_v17  ;;  %v673_v31 = vadd.f32 %v657_v20, %v605_v47  ;;  %v583_v53 = vmul.f32 %v1781_v16, %v1916_v43  ;;  %v650_v58 = vmul.f32 %v1790_v21, %v1972_v59  ;;  %v2354_v41 = vld [vmem:[#allocation21_spill] sm:$0xff] }
  0xad   :  { %v408_v52 = vadd.f32 %v386_v61, %v385_v33  ;;  %v598_v32 = vadd.f32 %v582_v37, %v530_v57  ;;  %v651_v7 = vmul.f32 %v1792_v10, %v1972_v59  ;;  %v532_v12 = vadd.f32 %v2344_v11, %v2343_v39  ;;  %v2356_v61 = vld [vmem:[#allocation29_spill] sm:$0xff] }
  0xae   :  { %406 = vadd.xlane.f32.xlu0 %v405_v25  ;;  %v688_v13 = vmax.f32 %v672_v9, 0.0  ;;  %v689_v40 = vmax.f32 %v673_v31, 0.0  ;;  %v599_v54 = vadd.f32 %v583_v53, %v531_v55  ;;  %v533_v30 = vadd.f32 %v2346_v29, %v2345_v3  ;;  %v2355_v25 = vld [vmem:[#allocation22_spill] sm:$0xff]  ;;  %v2357_v55 = vld [vmem:[#allocation13_spill] sm:$0xff] }
  0xaf   :  { %v666_v50 = vadd.f32 %v650_v58, %v598_v32  ;;  %v584_v24 = vmul.f32 %v1767_v6, %v2347_v49  ;;  %v585_v27 = vmul.f32 %v1781_v16, %v2347_v49  ;;  %v652_v1 = vmul.f32 %v1790_v21, %v2000_v4  ;;  %v2358_v9 = vld [vmem:[#allocation14_spill] sm:$0xff]  ;;  %v2359_v58 = vld [vmem:[#allocation28_spill] sm:$0xff] }
  0xb0   :  { %697 = vadd.xlane.f32.xlu1 %v696_v2  ;;  %v708_v18 = vadd.f32 %v689_v40, %v688_v13  ;;  %v667_v35 = vadd.f32 %v651_v7, %v599_v54  ;;  %v653_v0 = vmul.f32 %v1792_v10, %v2000_v4  ;;  %v470_v51 = vmul.f32 %v2349_v8, %v2348_v34  ;;  %v2361_v7 = vld [vmem:[#allocation16_spill] sm:$0xff] }
  0xb1   :  { %v682_v62 = vmax.f32 %v666_v50, 0.0  ;;  %v600_v14 = vadd.f32 %v584_v24, %v532_v12  ;;  %v601_v63 = vadd.f32 %v585_v27, %v533_v30  ;;  %v471_v23 = vmul.f32 %v2350_v15, %v2348_v34  ;;  %v2362_v12 = vld [vmem:[#allocation35_spill] sm:$0xff] }
  0xb2   :  { %409 = vadd.xlane.f32.xlu0 %v408_v52  ;;  %v683_v26 = vmax.f32 %v667_v35, 0.0  ;;  %v522_v22 = vmul.f32 %v2352_v42, %v2351_v44  ;;  %v523_v36 = vmul.f32 %v2353_v60, %v2351_v44  ;;  %v590_v45 = vmul.f32 %v2354_v41, %v1916_v43  ;;  %v2360_v52 = vld [vmem:[#allocation15_spill] sm:$0xff] }
  0xb3   :  { %v668_v5 = vadd.f32 %v652_v1, %v600_v14  ;;  %v669_v17 = vadd.f32 %v653_v0, %v601_v63  ;;  %v591_v56 = vmul.f32 %v2355_v25, %v1916_v43  ;;  %v658_v46 = vmul.f32 %v1800_v28, %v1972_v59  ;;  %v2363_v24 = vld [vmem:[#allocation27_spill] sm:$0xff]  ;;  %v2364_v1 = vld [vmem:[#allocation26_spill] sm:$0xff] }
  0xb4   :  { %709 = vadd.xlane.f32.xlu1 %v708_v18  ;;  %v699_v47 = vadd.f32 %v683_v26, %v682_v62  ;;  %v538_v2 = vadd.f32 %v522_v22, %v470_v51  ;;  %v539_v19 = vadd.f32 %v523_v36, %v471_v23  ;;  %v659_v20 = vmul.f32 %v2342_v38, %v1972_v59 }
  0xb5   :  { %v684_v57 = vmax.f32 %v668_v5, 0.0  ;;  %v685_v33 = vmax.f32 %v669_v17, 0.0  ;;  %v466_v37 = vmul.f32 %v2357_v55, %v2356_v61  ;;  %v467_v31 = vmul.f32 %v2358_v9, %v2356_v61 }
  0xb6   :  { %700 = vadd.xlane.f32.xlu0 %v699_v47  ;;  %v606_v53 = vadd.f32 %v590_v45, %v538_v2  ;;  %v607_v43 = vadd.f32 %v591_v56, %v539_v19  ;;  %v518_v32 = vmul.f32 %v2360_v52, %v2359_v58  ;;  %v519_v39 = vmul.f32 %v2361_v7, %v2359_v58  ;;  %v2155_v52 = vld [vmem:[%s2272_s3] sm:$0xff] }
  0xb7   :  { %v702_v11 = vadd.f32 %v685_v33, %v684_v57  ;;  %v586_v59 = vmul.f32 %v1767_v6, %v2362_v12  ;;  %v587_v13 = vmul.f32 %v1781_v16, %v2362_v12  ;;  %v654_v40 = vmul.f32 %v1790_v21, %v2006_v48 }
  0xb8   :  { %v674_v54 = vadd.f32 %v658_v46, %v606_v53  ;;  %v675_v3 = vadd.f32 %v659_v20, %v607_v43  ;;  %v534_v29 = vadd.f32 %v518_v32, %v466_v37  ;;  %v535_v30 = vadd.f32 %v519_v39, %v467_v31 }
  0xb9   :  { %703 = vadd.xlane.f32.xlu1 %v702_v11  ;;  %v655_v50 = vmul.f32 %v1792_v10, %v2006_v48  ;;  %v472_v27 = vmul.f32 %v2349_v8, %v2363_v24  ;;  %v473_v6 = vmul.f32 %v2350_v15, %v2363_v24  ;;  %v524_v16 = vmul.f32 %v2352_v42, %v2364_v1 }
  0xba   :  { %v690_v18 = vmax.f32 %v674_v54, 0.0  ;;  %v691_v35 = vmax.f32 %v675_v3, 0.0  ;;  %v602_v21 = vadd.f32 %v586_v59, %v534_v29  ;;  %v603_v0 = vadd.f32 %v587_v13, %v535_v30  ;;  %v2366_v29 = vld [vmem:[#allocation12_spill] sm:$0xff] }
  0xbb   :  { %v525_v34 = vmul.f32 %v2353_v60, %v2364_v1  ;;  %v540_v51 = vadd.f32 %v524_v16, %v472_v27  ;;  %v592_v10 = vmul.f32 %v2354_v41, %v2347_v49  ;;  %v593_v62 = vmul.f32 %v2355_v25, %v2347_v49 }
  0xbc   :  { %v711_v14 = vadd.f32 %v691_v35, %v690_v18  ;;  %v670_v63 = vadd.f32 %v654_v40, %v602_v21  ;;  %v671_v23 = vadd.f32 %v655_v50, %v603_v0  ;;  %v660_v26 = vmul.f32 %v1800_v28, %v2000_v4 }
  0xbd   :  { %v541_v44 = vadd.f32 %v525_v34, %v473_v6  ;;  %v608_v22 = vadd.f32 %v592_v10, %v540_v51  ;;  %v661_v36 = vmul.f32 %v2342_v38, %v2000_v4  ;;  %v474_v45 = vmul.f32 %v2349_v8, %v2356_v61 }
  0xbe   :  { %712 = vadd.xlane.f32.xlu0 %v711_v14  ;;  %v686_v5 = vmax.f32 %v670_v63, 0.0  ;;  %v687_v17 = vmax.f32 %v671_v23, 0.0  ;;  %v475_v49 = vmul.f32 %v2350_v15, %v2356_v61  ;;  %v526_v56 = vmul.f32 %v2352_v42, %v2359_v58 }
  0xbf   :  { %v609_v46 = vadd.f32 %v593_v62, %v541_v44  ;;  %v676_v47 = vadd.f32 %v660_v26, %v608_v22  ;;  %v527_v2 = vmul.f32 %v2353_v60, %v2359_v58  ;;  %v594_v4 = vmul.f32 %v2354_v41, %v2362_v12  ;;  %v2125_v60 = vld [vmem:[%s2272_s3 + $0x18] sm:$0xff]  ;;  %v2147_v58 = vld [vmem:[%s2272_s3 + $0x8] sm:$0xff] }
  0xc0   :  { %v705_v19 = vadd.f32 %v687_v17, %v686_v5  ;;  %v542_v20 = vadd.f32 %v526_v56, %v474_v45  ;;  %v595_v8 = vmul.f32 %v2355_v25, %v2362_v12  ;;  %v662_v57 = vmul.f32 %v1800_v28, %v2006_v48 }
  0xc1   :  { %v677_v15 = vadd.f32 %v661_v36, %v609_v46  ;;  %v692_v33 = vmax.f32 %v676_v47, 0.0  ;;  %v543_v61 = vadd.f32 %v527_v2, %v475_v49  ;;  %v663_v42 = vmul.f32 %v2342_v38, %v2006_v48  ;;  %v2135_v38 = vld [vmem:[%s2272_s3 + $0x10] sm:$0xff] }
  0xc2   :  { %706 = vadd.xlane.f32.xlu1 %v705_v19  ;;  %v610_v55 = vadd.f32 %v594_v4, %v542_v20  ;;  %v1574_v25 = vmov 0.0   ;;  %v2365_v39 = vlaneseq }
  0xc3   :  { %v693_v41 = vmax.f32 %v677_v15, 0.0  ;;  %v611_v37 = vadd.f32 %v595_v8, %v543_v61  ;;  %1424 = vmatprep.subr.mxu0 %v1574_v25  ;;  %1435 = vmatprep.subr.mxu1 %v1574_v25 }
  0xc4   :  { %v678_v9 = vadd.f32 %v662_v57, %v610_v55  ;;  %1425 = vmatpush3.xpose.msk.msra.mxu0 %vm840_vm0, %v2125_v60  ;;  %1432 = vmatprep.mubr.msk.f32.mxu0 %vm1575_vm1, %v1574_v25  ;;  %v737_v11 = vand.u32 127, %v2365_v39 }
  0xc5   :  { %v714_v28 = vadd.f32 %v693_v41, %v692_v33  ;;  %v679_v31 = vadd.f32 %v663_v42, %v611_v37  ;;  %1426 = vmatprep.subr.mxu0 %v1574_v25  ;;  %1439 = vmatprep.mubr.msk.f32.mxu1 %vm1575_vm1, %v1574_v25 }
  0xc6   :  { %v694_v48 = vmax.f32 %v678_v9, 0.0  ;;  %v742_v13 = vadd.s32 4294967288, %v737_v11  ;;  %v749_v40 = vadd.s32 4294967280, %v737_v11  ;;  %v756_v3 = vadd.s32 4294967272, %v737_v11 }
  0xc7   :  { %715 = vadd.xlane.f32.xlu0 %v714_v28  ;;  %v695_v53 = vmax.f32 %v679_v31, 0.0  ;;  %v740_v27 = vsub.s32 %v737_v11, %v2366_v29 }
  0xc8   :  { %1427 = vmatpush3.xpose.msk.msra.mxu0 %vm840_vm0, %v2135_v38  ;;  %v2162_v30 = vsub.s32 %v742_v13, %v2366_v29  ;;  %v752_v16 = vsub.s32 %v749_v40, %v2366_v29  ;;  %v759_v0 = vsub.s32 %v756_v3, %v2366_v29 }
  0xc9   :  { %v717_v43 = vadd.f32 %v695_v53, %v694_v48  ;;  %1428 = vmatprep.subr.mxu0 %v1574_v25 }
  0xcb   :  { %718 = vadd.xlane.f32.xlu0 %v717_v43 }
  0xcc   :  { %1429 = vmatpush3.xpose.msk.msra.mxu0 %vm840_vm0, %v2147_v58 }
  0xcd   :  { %1430 = vmatprep.subr.mxu0 %v1574_v25 }
  0xd0   :  { %1431 = vmatpush3.xpose.msk.msra.mxu0 %vm840_vm0, %v2155_v52 }
  0xd1   :  { %1453 = vmatprep.subr.mxu0 %v1574_v25 }
 0x12b   :  { %v389_v7 = vpop.xlane.xlu0 %388 }
 0x12c   :  { %v392_v32 = vpop.xlane.xlu1 %391  ;;  %v412_v6 = vmul.f32 0.00390625, %v389_v7 }
 0x12d   :  { %v413_v24 = vmul.f32 0.00390625, %v392_v32 }
 0x12e   :  { %v741_v62 = vrot.slane %v412_v6, %v740_v27 }
 0x12f   :  { %v401_v12 = vpop.xlane.xlu0 %400  ;;  %v746_v10 = vrot.slane %v413_v24, %v2162_v30  ;;  %v965_v24 = vld [vmem:[%s2275_s6 + $0x8] sm:$0xff] }
 0x130   :  { %v416_v21 = vmul.f32 0.00390625, %v401_v12  ;;  %1436 = vmatpush3.xpose.msk.msra.mxu1 %vm840_vm0, %v965_v24 }
 0x131   :  { %v395_v59 = vpop.xlane.xlu1 %394  ;;  %v748_v5 = vsel %vm747_vm2, %v746_v10, %v741_v62  ;;  %1437 = vmatprep.subr.mxu1 %v1574_v25 }
 0x132   :  { %v414_v18 = vmul.f32 0.00390625, %v395_v59  ;;  %v766_v44 = vrot.slane %v416_v21, %v740_v27 }
 0x133   :  { %v404_v54 = vpop.xlane.xlu0 %403 }
 0x134   :  { %v417_v1 = vmul.f32 0.00390625, %v404_v54  ;;  %v753_v63 = vrot.slane %v414_v18, %v752_v16 }
 0x135   :  { %v398_v50 = vpop.xlane.xlu1 %397 }
 0x136   :  { %v415_v34 = vmul.f32 0.00390625, %v398_v50  ;;  %v770_v14 = vrot.slane %v417_v1, %v2162_v30  ;;  %v755_v56 = vsel %vm754_vm3, %v753_v63, %v748_v5 }
 0x137   :  { %v407_v35 = vpop.xlane.xlu0 %406 }
 0x138   :  { %v418_v51 = vmul.f32 0.00390625, %v407_v35  ;;  %v760_v22 = vrot.slane %v415_v34, %v759_v0  ;;  %v771_v17 = vsel %vm747_vm2, %v770_v14, %v766_v44 }
 0x139   :  { %v698_v36 = vpop.xlane.xlu1 %697 }
 0x13a   :  { %v775_v23 = vrot.slane %v418_v51, %v752_v16  ;;  %v762_v47 = vsel %vm761_vm4, %v760_v22, %v755_v56  ;;  %v720_v61 = vmul.f32 0.00390625, %v698_v36  ;;  %v2208_v56 = vld [vmem:[%s2273_s4] ss:$0 sm:$0xff] }
 0x13b   :  { %v410_v26 = vpop.xlane.xlu0 %409 }
 0x13c   :  { %v419_v45 = vmul.f32 0.00390625, %v410_v26  ;;  %v776_v46 = vsel %vm754_vm3, %v775_v23, %v771_v17  ;;  %v798_v48 = vrot.slane %v720_v61, %v740_v27 }
 0x13d   :  { %v710_v19 = vpop.xlane.xlu1 %709 }
 0x13e   :  { %v780_v49 = vrot.slane %v419_v45, %v759_v0  ;;  %v724_v37 = vmul.f32 0.00390625, %v710_v19 }
 0x13f   :  { %v701_v20 = vpop.xlane.xlu0 %700 }
 0x140   :  { %v781_v2 = vsel %vm761_vm4, %v780_v49, %v776_v46  ;;  %v721_v15 = vmul.f32 0.00390625, %v701_v20  ;;  %v817_v39 = vrot.slane %v724_v37, %v740_v27  ;;  %v964_v27 = vld [vmem:[%s2275_s6] sm:$0xff] }
 0x141   :  { %v783_v4 = vsel %vm782_vm5, %v781_v2, %v762_v47  ;;  %1438 = vmatpush3.xpose.msk.msra.mxu1 %vm840_vm0, %v964_v27  ;;  %v2213_v47 = vld [vmem:[%s2274_s5] ss:$0 sm:$0xff] }
 0x142   :  { %1433 = vmatmul.mubr.msk.f32.vlgmr.msra.gmra.mxu0 %vm840_vm0, %v783_v4  ;;  %786 = vst.msk [vmem:[#allocation2] sm:$0x3] %vm785_vm6, %v783_v4  ;;  %v704_v8 = vpop.xlane.xlu1 %703  ;;  %v802_v9 = vrot.slane %v721_v15, %v2162_v30  ;;  %1442 = vmatprep.subr.mxu1 %v1574_v25 }
 0x143   :  { %1457 = vmatprep.mubr.msk.f32.mxu0 %vm1575_vm1, %v1574_v25  ;;  %v722_v55 = vmul.f32 0.00390625, %v704_v8  ;;  %1454 = vmatpush3.xpose.msk.msra.mxu0 %vm840_vm0, %v965_v24 }
 0x144   :  { %v803_v11 = vsel %vm747_vm2, %v802_v9, %v798_v48  ;;  %1455 = vmatprep.subr.mxu0 %v1574_v25 }
 0x145   :  { %v807_v43 = vrot.slane %v722_v55, %v752_v16 }
 0x147   :  { %v713_v57 = vpop.xlane.xlu0 %712  ;;  %v808_v54 = vsel %vm754_vm3, %v807_v43, %v803_v11  ;;  %1456 = vmatpush3.xpose.msk.msra.mxu0 %vm840_vm0, %v964_v27 }
 0x148   :  { %v725_v42 = vmul.f32 0.00390625, %v713_v57 }
 0x14a   :  { %v821_v53 = vrot.slane %v725_v42, %v2162_v30 }
 0x14b   :  { %v707_v33 = vpop.xlane.xlu1 %706 }
 0x14c   :  { %v723_v28 = vmul.f32 0.00390625, %v707_v33  ;;  %v822_v13 = vsel %vm747_vm2, %v821_v53, %v817_v39 }
 0x14e   :  { %v812_v12 = vrot.slane %v723_v28, %v759_v0 }
 0x150   :  { %v716_v41 = vpop.xlane.xlu0 %715  ;;  %v813_v29 = vsel %vm761_vm4, %v812_v12, %v808_v54 }
 0x151   :  { %v726_v31 = vmul.f32 0.00390625, %v716_v41 }
 0x153   :  { %v826_v32 = vrot.slane %v726_v31, %v752_v16 }
 0x154   :  { %v719_v7 = vpop.xlane.xlu0 %718 }
 0x155   :  { %v727_v59 = vmul.f32 0.00390625, %v719_v7  ;;  %v827_v3 = vsel %vm754_vm3, %v826_v32, %v822_v13 }
 0x157   :  { %v831_v40 = vrot.slane %v727_v59, %v759_v0 }
 0x159   :  { %v832_v50 = vsel %vm761_vm4, %v831_v40, %v827_v3 }
 0x15a   :  { %v833_v30 = vsel %vm782_vm5, %v832_v50, %v813_v29 }
 0x15b   :  { %835 = vst.msk [vmem:[#allocation4] sm:$0x3] %vm785_vm6, %v833_v30 }
 0x202   :  { %v921_v6 = vpop.f32.mrf.mxu0 }
 0x203   :  { %v925_v1 = vsel %vm785_vm6, %v921_v6, 0.0 }
 0x204   :  { %v926_v16 = vrot.slane %v925_v1, 4  ;;  %v1434_v18 = vpop.f32.mrf.mxu0 }
 0x206   :  { %v927_v35 = vadd.f32 %v926_v16, %v925_v1 }
 0x208   :  { %v928_v21 = vrot.slane %v927_v35, 2 }
 0x20a   :  { %v929_v0 = vadd.f32 %v928_v21, %v927_v35 }
 0x20c   :  { %v930_v34 = vrot.slane %v929_v0, 1 }
 0x20e   :  { %v931_v51 = vadd.f32 %v930_v34, %v929_v0  ;;  %v2239_v0 = vld [vmem:[%s2276_s7] ss:$0 sm:$0xff]  ;;  %s1576_s7 = smov [#allocation4]  }
 0x20f   :  { %s1345_s13 = sshll.u32 %s1576_s7, 4  ;;  %s1346_s13 = int_to_ptr.vmem [resolvable:$true] %s1345_s13 }
 0x210   :  { %v933_v10 = vmul.f32 0.5, %v931_v51  ;;  %s1484_s15 = scalar_lea.vmem %s1346_s13, 32  ;;  %p1489_p1 = scmp.lt.s32.totalorder %s1346_s13, %s1346_s13 }
 0x211   :  { %p1485_p0 = scmp.ne.s32.totalorder %s1346_s13, %s1484_s15  ;;  %p1490_p2 = scmp.lt.s32.totalorder %s1484_s15, %s1484_s15 }
 0x212   :  { %v934_v62 = vsub.f32 %v921_v6, %v933_v10  ;;  %v2244_v10 = vld [vmem:[%s2277_s8] ss:$0 sm:$0xff]  ;;  %s1577_s8 = smov [#allocation2]  }
 0x213   :  { %s1335_s14 = sshll.u32 %s1577_s8, 4  ;;  %p1491_p3 = por %p1490_p2, %p1489_p1  ;;  %s1336_s14 = int_to_ptr.vmem [resolvable:$true] %s1335_s14 }
 0x214   :  { %v935_v14 = vmul.f32 %v934_v62, %v934_v62 }
 0x215   :  { %p1492_p4 = pnand %p1491_p3, %p1485_p0 }
 0x216   :  { %v936_v63 = vsel %vm785_vm6, %v935_v14, 0.0 }
 0x217   :  { %v937_v23 = vrot.slane %v936_v63, 4 }
 0x219   :  { %v938_v26 = vadd.f32 %v937_v23, %v936_v63 }
 0x21b   :  { %v939_v44 = vrot.slane %v938_v26, 2 }
 0x21d   :  { %v940_v22 = vadd.f32 %v939_v44, %v938_v26 }
 0x21f   :  { %v941_v36 = vrot.slane %v940_v22, 1 }
 0x221   :  { %v942_v45 = vadd.f32 %v941_v36, %v940_v22 }
 0x223   :  { %v943_v5 = vmul.f32 0.5, %v942_v45 }
 0x225   :  { %v944_v17 = vadd.f32 1e-05, %v943_v5 }
 0x227   :  { %1476 = vrsqrt.f32 %v944_v17 }
 0x234   :  { %v1477_v49 = vpop.eup %1476 }
 0x235   :  { %v946_v46 = vmul.f32 %v1477_v49, %v934_v62 }
 0x237   :  { %v954_v2 = vmul.f32 %v2208_v56, %v946_v46 }
 0x239   :  { %v962_v4 = vadd.f32 %v2213_v47, %v954_v2 }
 0x23b   :  { %v963_v19 = vmax.f32 %v962_v4, 0.0 }
 0x23d   :  { %1440 = vmatmul.mubr.msk.f32.vlgmr.msra.gmra.mxu1 %vm840_vm0, %v963_v19 }
 0x23e   :  { %1443 = vmatpush3.xpose.msk.msra.mxu1 %vm840_vm0, %v2125_v60  ;;  %1450 = vmatprep.mubr.msk.f32.mxu1 %vm1575_vm1, %v1574_v25 }
 0x23f   :  { %1444 = vmatprep.subr.mxu1 %v1574_v25 }
 0x242   :  { %1445 = vmatpush3.xpose.msk.msra.mxu1 %vm840_vm0, %v2135_v38 }
 0x243   :  { %1446 = vmatprep.subr.mxu1 %v1574_v25 }
 0x246   :  { %1447 = vmatpush3.xpose.msk.msra.mxu1 %vm840_vm0, %v2147_v58 }
 0x247   :  { %1448 = vmatprep.subr.mxu1 %v1574_v25 }
 0x24a   :  { %1449 = vmatpush3.xpose.msk.msra.mxu1 %vm840_vm0, %v2155_v52 }
 0x24d   :  { %1451 = vmatmul.mubr.msk.f32.vlgmr.msra.gmra.mxu1 %vm840_vm0, %v833_v30 }
 0x2fd   :  { %v1041_v60 = vpop.f32.mrf.mxu1 }
 0x2fe   :  { %v1046_v20 = vsel %vm1045_vm7, %v1041_v60, 0.0 }
 0x2ff   :  { %v1047_v8 = vrot.slane %v1046_v20, 4  ;;  %v1441_v57 = vpop.f32.mrf.mxu1 }
 0x301   :  { %v1048_v15 = vadd.f32 %v1047_v8, %v1046_v20 }
 0x303   :  { %v1049_v38 = vrot.slane %v1048_v15, 2 }
 0x305   :  { %v1050_v33 = vadd.f32 %v1049_v38, %v1048_v15 }
 0x307   :  { %v1051_v61 = vrot.slane %v1050_v33, 1 }
 0x309   :  { %v1052_v42 = vadd.f32 %v1051_v61, %v1050_v33 }
 0x30b   :  { %v1053_v55 = vmul.f32 0.5, %v1052_v42 }
 0x30d   :  { %v1054_v58 = vsub.f32 %v1041_v60, %v1053_v55  ;;  %v1168_v41 = vpop.f32.mrf.mxu1 }
 0x30e   :  { %v1172_v25 = vsel %vm785_vm6, %v1168_v41, 0.0 }
 0x30f   :  { %v1055_v37 = vmul.f32 %v1054_v58, %v1054_v58  ;;  %v1173_v52 = vrot.slane %v1172_v25, 4  ;;  %v1452_v9 = vpop.f32.mrf.mxu1 }
 0x311   :  { %v1056_v28 = vsel %vm1045_vm7, %v1055_v37, 0.0  ;;  %v1174_v31 = vadd.f32 %v1173_v52, %v1172_v25 }
 0x312   :  { %v1057_v48 = vrot.slane %v1056_v28, 4 }
 0x313   :  { %v1175_v53 = vrot.slane %v1174_v31, 2 }
 0x314   :  { %v1058_v43 = vadd.f32 %v1057_v48, %v1056_v28 }
 0x315   :  { %v1176_v32 = vadd.f32 %v1175_v53, %v1174_v31 }
 0x316   :  { %v1059_v7 = vrot.slane %v1058_v43, 2 }
 0x317   :  { %v1177_v39 = vrot.slane %v1176_v32, 1 }
 0x318   :  { %v1060_v11 = vadd.f32 %v1059_v7, %v1058_v43 }
 0x319   :  { %v1178_v12 = vadd.f32 %v1177_v39, %v1176_v32 }
 0x31a   :  { %v1061_v59 = vrot.slane %v1060_v11, 1 }
 0x31b   :  { %v1179_v13 = vmul.f32 0.5, %v1178_v12 }
 0x31c   :  { %v1062_v40 = vadd.f32 %v1061_v59, %v1060_v11 }
 0x31d   :  { %v1180_v54 = vsub.f32 %v1168_v41, %v1179_v13 }
 0x31e   :  { %v1063_v3 = vmul.f32 0.5, %v1062_v40 }
 0x31f   :  { %v1181_v29 = vmul.f32 %v1180_v54, %v1180_v54 }
 0x320   :  { %v1064_v50 = vadd.f32 1e-05, %v1063_v3 }
 0x321   :  { %v1182_v30 = vsel %vm785_vm6, %v1181_v29, 0.0 }
 0x322   :  { %1478 = vrsqrt.f32 %v1064_v50  ;;  %v1183_v24 = vrot.slane %v1182_v30, 4 }
 0x324   :  { %v1184_v27 = vadd.f32 %v1183_v24, %v1182_v30 }
 0x326   :  { %v1185_v6 = vrot.slane %v1184_v27, 2 }
 0x328   :  { %v1186_v1 = vadd.f32 %v1185_v6, %v1184_v27 }
 0x32a   :  { %v1187_v16 = vrot.slane %v1186_v1, 1 }
 0x32c   :  { %v1188_v18 = vadd.f32 %v1187_v16, %v1186_v1 }
 0x32e   :  { %v1189_v35 = vmul.f32 0.5, %v1188_v18 }
 0x32f   :  { %v1479_v21 = vpop.eup %1478 }
 0x330   :  { %v1066_v34 = vmul.f32 %v1479_v21, %v1054_v58  ;;  %v1190_v51 = vadd.f32 1e-05, %v1189_v35 }
 0x332   :  { %1480 = vrsqrt.f32 %v1190_v51  ;;  %v1074_v62 = vmul.f32 %v2239_v0, %v1066_v34 }
 0x334   :  { %v1082_v14 = vadd.f32 %v2244_v10, %v1074_v62 }
 0x336   :  { %1083 = vst.msk [vmem:[#allocation6] sm:$0x3] %vm1045_vm7, %v1082_v14 }
 0x33f   :  { %v1481_v63 = vpop.eup %1480 }
 0x340   :  { %v1192_v23 = vmul.f32 %v1481_v63, %v1180_v54 }
 0x342   :  { %v1200_v26 = vmul.f32 %v2208_v56, %v1192_v23 }
 0x344   :  { %v1208_v44 = vadd.f32 %v2213_v47, %v1200_v26 }
 0x346   :  { %v1209_v22 = vmax.f32 %v1208_v44, 0.0 }
 0x348   :  { %1458 = vmatmul.mubr.msk.f32.vlgmr.msra.gmra.mxu0 %vm840_vm0, %v1209_v22 }
 0x349   :  { %1495 = shalt.err (!%p1492_p4)
}
 0x34a   :  { %1348 = dma.vmem_to_hbm [thread:$0]  %s1346_s13, 32, %s2279_s10, [#allocation5]  }
 0x34b   :  { %s1504_s1 = scalar_lea.vmem %s1336_s14, 32  ;;  %p1509_p6 = scmp.lt.s32.totalorder %s1336_s14, %s1336_s14 }
 0x34c   :  { %p1505_p5 = scmp.ne.s32.totalorder %s1336_s14, %s1504_s1  ;;  %p1510_p7 = scmp.lt.s32.totalorder %s1504_s1, %s1504_s1 }
 0x34e   :  { %p1511_p8 = por %p1510_p7, %p1509_p6 }
 0x350   :  { %p1512_p9 = pnand %p1511_p8, %p1505_p5 }
 0x352   :  { %1515 = shalt.err (!%p1512_p9)
}
 0x353   :  { %1338 = dma.vmem_to_hbm [thread:$0]  %s1336_s14, 32, %s2278_s9, [#allocation3]  }
 0x354   :  { %s1578_s19 = smov [#allocation6]  }
 0x355   :  { %s1355_s20 = sshll.u32 %s1578_s19, 4  ;;  %s1356_s20 = int_to_ptr.vmem [resolvable:$true] %s1355_s20 }
 0x356   :  { %s1524_s21 = scalar_lea.vmem %s1356_s20, 32  ;;  %p1529_p11 = scmp.lt.s32.totalorder %s1356_s20, %s1356_s20 }
 0x357   :  { %p1525_p10 = scmp.ne.s32.totalorder %s1356_s20, %s1524_s21  ;;  %p1530_p12 = scmp.lt.s32.totalorder %s1524_s21, %s1524_s21 }
 0x359   :  { %p1531_p13 = por %p1530_p12, %p1529_p11 }
 0x35b   :  { %p1532_p0 = pnand %p1531_p13, %p1525_p10 }
 0x35d   :  { %1535 = shalt.err (!%p1532_p0)
}
 0x35e   :  { %1358 = dma.vmem_to_hbm [thread:$0]  %s1356_s20, 32, %s2280_s11, [#allocation5]  }
 0x35f   :  { %s1579_s9 = smov [#allocation7]  }
 0x360   :  { %s1365_s11 = sshll.u32 %s1579_s9, 4  ;;  %s1366_s11 = int_to_ptr.vmem [resolvable:$true] %s1365_s11 }
 0x361   :  { %s1544_s23 = scalar_lea.vmem %s1366_s11, 32  ;;  %p1549_p2 = scmp.lt.s32.totalorder %s1366_s11, %s1366_s11 }
 0x362   :  { %p1545_p1 = scmp.ne.s32.totalorder %s1366_s11, %s1544_s23  ;;  %p1550_p3 = scmp.lt.s32.totalorder %s1544_s23, %s1544_s23 }
 0x364   :  { %p1551_p4 = por %p1550_p3, %p1549_p2 }
 0x366   :  { %p1552_p5 = pnand %p1551_p4, %p1545_p1 }
 0x408   :  { %v1287_v36 = vpop.f32.mrf.mxu0 }
 0x409   :  { %v1291_v45 = vsel %vm1045_vm7, %v1287_v36, 0.0 }
 0x40a   :  { %v1292_v5 = vrot.slane %v1291_v45, 4  ;;  %v1459_v17 = vpop.f32.mrf.mxu0 }
 0x40c   :  { %v1293_v49 = vadd.f32 %v1292_v5, %v1291_v45 }
 0x40e   :  { %v1294_v56 = vrot.slane %v1293_v49, 2 }
 0x410   :  { %v1295_v46 = vadd.f32 %v1294_v56, %v1293_v49 }
 0x412   :  { %v1296_v47 = vrot.slane %v1295_v46, 1 }
 0x414   :  { %v1297_v2 = vadd.f32 %v1296_v47, %v1295_v46 }
 0x416   :  { %v1298_v4 = vmul.f32 0.5, %v1297_v2 }
 0x418   :  { %v1299_v19 = vsub.f32 %v1287_v36, %v1298_v4 }
 0x41a   :  { %v1300_v60 = vmul.f32 %v1299_v19, %v1299_v19 }
 0x41c   :  { %v1301_v20 = vsel %vm1045_vm7, %v1300_v60, 0.0 }
 0x41d   :  { %v1302_v8 = vrot.slane %v1301_v20, 4 }
 0x41f   :  { %v1303_v57 = vadd.f32 %v1302_v8, %v1301_v20 }
 0x421   :  { %v1304_v15 = vrot.slane %v1303_v57, 2 }
 0x423   :  { %v1305_v38 = vadd.f32 %v1304_v15, %v1303_v57 }
 0x425   :  { %v1306_v33 = vrot.slane %v1305_v38, 1 }
 0x427   :  { %v1307_v61 = vadd.f32 %v1306_v33, %v1305_v38 }
 0x429   :  { %v1308_v42 = vmul.f32 0.5, %v1307_v61 }
 0x42b   :  { %v1309_v55 = vadd.f32 1e-05, %v1308_v42 }
 0x42d   :  { %1482 = vrsqrt.f32 %v1309_v55 }
 0x43a   :  { %v1483_v58 = vpop.eup %1482 }
 0x43b   :  { %v1311_v41 = vmul.f32 %v1483_v58, %v1299_v19 }
 0x43d   :  { %v1319_v25 = vmul.f32 %v2239_v0, %v1311_v41 }
 0x43f   :  { %v1327_v37 = vadd.f32 %v2244_v10, %v1319_v25 }
 0x441   :  { %1328 = vst.msk [vmem:[#allocation7] sm:$0x3] %vm1045_vm7, %v1327_v37 }
 0x442   :  { %1555 = shalt.err (!%p1552_p5)
}
 0x443   :  { %1368 = dma.vmem_to_hbm [thread:$0]  %s1366_s11, 32, %s2281_s12, [#allocation8]  }
 0x444   :  { %1564 = dma.done.wait [#allocation3], 32  }
 0x445   :  { %1565 = vsyncadd [#allocation3], 4294967264 }
 0x446   :  { %1566 = dma.done.wait [#allocation5], 64  }
 0x447   :  { %1567 = vsyncadd [#allocation5], 4294967232 }
 0x448   :  { %1568 = dma.done.wait [#allocation8], 32  }
 0x449   :  { %1569 = vsyncadd [#allocation8], 4294967264 }
 0x44a   :  { %1381 = vsyncpa [#allocation3], 1 }
 0x44b   :  { %1382 = vsyncpa [#allocation5], 1 }
 0x44c   :  { %1383 = vsyncpa [#allocation8], 1 }

</bundles_post_ra>
